<compile_context>
chip_gen: v5e
topology: v5e:2x2
jax: 0.10.0
libtpu: 0.0.40
codegen_flags: <defaults>
</compile_context>

<pallas_src>
import jax
import jax.numpy as jnp
from jax.experimental import pallas as pl
from jax.experimental.pallas import tpu as pltpu


# --------------------------- wrapper-side helpers ---------------------------
def _pool_matrix(B, n_windows, win, sample_stride, total_cols, l_major=False):
    """Batched AvgPool1d as a matrix acting on a (total_cols, C) slab.

    Input rows are laid out sample-major with stride `sample_stride` (the last
    sample may be truncated, but only garbage rows are missing).  Output row
    order is b*n_windows + j (default) or j*B + b (l_major, used before fc1).
    """
    r = jnp.arange(B * n_windows)
    if l_major:
        j_r, b_r = r // B, r % B
    else:
        b_r, j_r = r // n_windows, r % n_windows
    c = jnp.arange(total_cols)
    b_c, p_c = c // sample_stride, c % sample_stride
    start = win * j_r
    m = ((b_r[:, None] == b_c[None, :])
         & (p_c[None, :] >= start[:, None])
         & (p_c[None, :] < start[:, None] + win))
    return m.astype(jnp.float32) / float(win)


def _pack_blocks(blocks):
    """Pack 2-D f32 arrays into one (R, lane) buffer, 8-row aligned blocks."""
    max_c = max(a.shape[1] for _, a in blocks)
    lane = ((max_c + 127) // 128) * 128
    layout, parts, off = {}, [], 0
    for name, arr in blocks:
        arr = jnp.asarray(arr, jnp.float32)
        r, c = arr.shape
        rpad = (-r) % 8
        parts.append(jnp.pad(arr, ((0, rpad), (0, lane - c))))
        layout[name] = (off, r, c)
        off += r + rpad
    return jnp.concatenate(parts, axis=0), layout


# --------------------------------- kernel -----------------------------------
def _build_kernel(layout, B, K1, K2, l6):
    def kernel(x_ref, p_ref, out_ref):
        def par(name):
            off, r, c = layout[name]
            return p_ref[off:off + r, :c]          # 8-aligned static slice

        def im2col(h, K):
            # K lane-concatenated shifted copies; rows whose window crosses a
            # sample boundary become garbage and are skipped by the pool mats.
            rv = h.shape[0] - (K - 1)
            return jnp.concatenate([h[k:k + rv, :] for k in range(K)], axis=-1)

        def dense(a, wname, bname):
            return (jnp.dot(a, par(wname), preferred_element_type=jnp.float32)
                    + par(bname))

        relu = lambda t: jnp.maximum(t, 0.0)

        h = relu(dense(x_ref[...], "w1a", "b1a"))            # conv1a (B*l1, C1a)
        h = relu(dense(im2col(h, K1), "w1b", "b1b"))          # conv1b
        h = jnp.dot(par("p1"), h, preferred_element_type=jnp.float32)   # pool1
        h = relu(dense(im2col(h, K2), "w2", "b2"))            # conv2
        h = relu(dense(im2col(h, K2), "w2b", "b2b"))          # conv2b
        h = jnp.dot(par("p2b"), h, preferred_element_type=jnp.float32)  # pool2b (l6*B, C2b)
        # (B, l6*C2b) lane-concat -> single fc1 matmul (torch flatten order is
        # already baked into the wrapper-side wfc1 reshape).
        wide = jnp.concatenate([h[l * B:(l + 1) * B, :] for l in range(l6)],
                               axis=-1)
        hid = relu(dense(wide, "wfc1", "bfc1"))
        out_ref[...] = dense(hid, "wout", "bout")             # single store
    return kernel


# --------------------------------- wrapper ----------------------------------
def conv3fc1_forward(x, params):
    (w1a, b1a, w1b, b1b, w2, b2, w2b, b2b, wfc1, bfc1, wout, bout) = params
    B = x.shape[0]
    L = x.shape[1] // 2
    K1, c_in, c1a = w1a.shape
    c1b = w1b.shape[2]
    K2, _, c2 = w2.shape
    c2b = w2b.shape[2]
    l6, _, hidden = wfc1.shape
    out_features = wout.shape[1]

    l1 = L - K1 + 1
    l2 = l1 - K1 + 1
    l3 = l2 // 3
    l4 = l3 - K2 + 1
    l5 = l4 - K2 + 1
    assert l6 == l5 // 5

    # Input: torch.reshape(x, (B, 2, L)) -> (B, L, 2) -> im2col for conv1a.
    x_nlc = jnp.transpose(x.reshape(B, 2, L), (0, 2, 1)).astype(jnp.float32)
    x_col = jnp.concatenate([x_nlc[:, k:k + l1, :] for k in range(K1)], axis=-1)
    x_col = x_col.reshape(B * l1, K1 * c_in)                  # (B*l1, K1*2)

    # Slab row counts as they flow through the kernel (last sample truncated
    # by K-1 garbage rows per conv; pooling matrices only read valid rows).
    rows_h2 = B * l1 - (K1 - 1)            # conv1b output rows
    rows_h5 = B * l3 - 2 * (K2 - 1)        # conv2b output rows

    p1 = _pool_matrix(B, l3, 3, sample_stride=l1, total_cols=rows_h2)
    p2b = _pool_matrix(B, l6, 5, sample_stride=l3, total_cols=rows_h5,
                       l_major=True)

    blocks = [
        ("w1a", w1a.reshape(K1 * c_in, c1a)),
        ("w1b", w1b.reshape(K1 * c1a, c1b)),
        ("w2", w2.reshape(K2 * c1b, c2)),
        ("w2b", w2b.reshape(K2 * c2, c2b)),
        ("p1", p1), ("p2b", p2b),
        ("wfc1", wfc1.reshape(l6 * c2b, hidden)),   # row l*C2b + c
        ("wout", wout),
        ("b1a", b1a), ("b1b", b1b), ("b2", b2), ("b2b", b2b),
        ("bfc1", bfc1), ("bout", bout),
    ]
    pbuf, layout = _pack_blocks(blocks)

    kernel = _build_kernel(layout, B, K1, K2, l6)
    vmem = lambda: pl.BlockSpec(memory_space=pltpu.MemorySpace.VMEM)
    return pl.pallas_call(
        kernel,
        out_shape=jax.ShapeDtypeStruct((B, out_features), jnp.float32),
        in_specs=[vmem(), vmem()],
        out_specs=vmem(),
    )(x_col, pbuf)


# ---------------- pure-JAX reference (for correctness check only) -----------
def conv3fc1_reference(x, params):
    (w1a, b1a, w1b, b1b, w2, b2, w2b, b2b, wfc1, bfc1, wout, bout) = params
    B = x.shape[0]
    h = x.reshape(B, 2, -1)                                    # NCL

    def conv1d(xin, w_kio, bias):
        w_oik = jnp.transpose(w_kio, (2, 1, 0))                # (Cout, Cin, K)
        y = jax.lax.conv_general_dilated(
            xin, w_oik, window_strides=(1,), padding="VALID",
            dimension_numbers=("NCH", "OIH", "NCH"))
        return y + bias.reshape(1, -1, 1)

    def avgpool(xin, win):
        lout = xin.shape[2] // win
        xt = xin[:, :, :lout * win].reshape(B, xin.shape[1], lout, win)
        return xt.mean(axis=-1)

    h = jax.nn.relu(conv1d(h, w1a, b1a))
    h = jax.nn.relu(conv1d(h, w1b, b1b))
    h = avgpool(h, 3)
    h = jax.nn.relu(conv1d(h, w2, b2))
    h = jax.nn.relu(conv1d(h, w2b, b2b))
    h = avgpool(h, 5)
    flat = h.reshape(B, -1)                                    # torch.flatten(x, 1)
    wfc1_2d = jnp.transpose(wfc1, (1, 0, 2)).reshape(-1, wfc1.shape[2])
    h = jax.nn.relu(flat @ wfc1_2d + bfc1.reshape(-1))
    return h @ wout + bout.reshape(-1)


# ---------------- deterministic parameter construction ----------------------
def init_params(key, in_features=128, out_features=10,
                c1a=16, c1b=16, k1=5, c2=16, c2b=16, k2=5, hidden=32):
    L = in_features // 2
    l1 = L - k1 + 1
    l2 = l1 - k1 + 1
    l3 = l2 // 3
    l4 = l3 - k2 + 1
    l5 = l4 - k2 + 1
    l6 = l5 // 5                      # to_linear = c2b * l6
    ks = jax.random.split(key, 12)
    s = 0.1
    w1a = jax.random.normal(ks[0], (k1, 2, c1a), jnp.float32) * s
    b1a = jax.random.normal(ks[1], (1, c1a), jnp.float32) * s
    w1b = jax.random.normal(ks[2], (k1, c1a, c1b), jnp.float32) * s
    b1b = jax.random.normal(ks[3], (1, c1b), jnp.float32) * s
    w2 = jax.random.normal(ks[4], (k2, c1b, c2), jnp.float32) * s
    b2 = jax.random.normal(ks[5], (1, c2), jnp.float32) * s
    w2b = jax.random.normal(ks[6], (k2, c2, c2b), jnp.float32) * s
    b2b = jax.random.normal(ks[7], (1, c2b), jnp.float32) * s
    wfc1 = jax.random.normal(ks[8], (l6, c2b, hidden), jnp.float32) * s
    bfc1 = jax.random.normal(ks[9], (1, hidden), jnp.float32) * s
    wout = jax.random.normal(ks[10], (hidden, out_features), jnp.float32) * s
    bout = jax.random.normal(ks[11], (1, out_features), jnp.float32) * s
    return (w1a, b1a, w1b, b1b, w2, b2, w2b, b2b,
            wfc1, bfc1, wout, bout)


if __name__ == "__main__":
    in_features, out_features, batch = 128, 10, 2   # module probes with length-64 signals
    key = jax.random.PRNGKey(0)
    pkey, xkey = jax.random.split(key)
    params = init_params(pkey, in_features, out_features)
    x = jax.random.normal(xkey, (batch, in_features), jnp.float32)

    out = conv3fc1_forward(x, params)
    out = jax.block_until_ready(out)

    ref = conv3fc1_reference(x, params)
    assert out.shape == (batch, out_features)
    assert jnp.allclose(out, ref, atol=1e-4, rtol=1e-4)
    print("KERNEL_OK")
</pallas_src>

<mosaic_0001>
module attributes {stable_mosaic.version = 11 : i64} {
  func.func @kernel(%arg0: memref<120x10xf32, #tpu.memory_space<vmem>>, %arg1: memref<416x128xf32, #tpu.memory_space<vmem>>, %arg2: memref<2x10xf32, #tpu.memory_space<vmem>>) attributes {dimension_semantics = [], scalar_prefetch = 0 : i64, scratch_operands = 0 : i64, tpu.core_type = #tpu.core_type<tc>} {
    %c0 = arith.constant 0 : index
    %c0_0 = arith.constant 0 : index
    %0 = vector.load %arg0[%c0, %c0_0] : memref<120x10xf32, #tpu.memory_space<vmem>>, vector<120x10xf32>
    %c0_1 = arith.constant 0 : index
    %c0_2 = arith.constant 0 : index
    %1 = vector.load %arg1[%c0_1, %c0_2] : memref<416x128xf32, #tpu.memory_space<vmem>>, vector<10x16xf32>
    %cst = arith.constant dense<0.000000e+00> : vector<120x16xf32>
    %2 = tpu.matmul %0, %1, %cst {dimension_numbers = #tpu.dot_dimension_numbers<[1], [0], [0], [1], [0, 0, 1, 1], [], []>} : vector<120x10xf32>, vector<10x16xf32>, vector<120x16xf32> -> vector<120x16xf32>
    %c368 = arith.constant 368 : index
    %c0_3 = arith.constant 0 : index
    %3 = vector.load %arg1[%c368, %c0_3] : memref<416x128xf32, #tpu.memory_space<vmem>>, vector<1x16xf32>
    %4 = vector.broadcast %3 : vector<1x16xf32> to vector<120x16xf32>
    %5 = arith.addf %2, %4 : vector<120x16xf32>
    %cst_4 = arith.constant 0.000000e+00 : f32
    %6 = vector.broadcast %cst_4 : f32 to vector<120x16xf32>
    %7 = arith.maximumf %5, %6 : vector<120x16xf32>
    %8 = vector.extract_strided_slice %7 {offsets = [0, 0], sizes = [116, 16], strides = [1, 1]} : vector<120x16xf32> to vector<116x16xf32>
    %9 = vector.extract_strided_slice %7 {offsets = [1, 0], sizes = [116, 16], strides = [1, 1]} : vector<120x16xf32> to vector<116x16xf32>
    %10 = vector.extract_strided_slice %7 {offsets = [2, 0], sizes = [116, 16], strides = [1, 1]} : vector<120x16xf32> to vector<116x16xf32>
    %11 = vector.extract_strided_slice %7 {offsets = [3, 0], sizes = [116, 16], strides = [1, 1]} : vector<120x16xf32> to vector<116x16xf32>
    %12 = vector.extract_strided_slice %7 {offsets = [4, 0], sizes = [116, 16], strides = [1, 1]} : vector<120x16xf32> to vector<116x16xf32>
    %13 = tpu.concatenate %8, %9, %10, %11, %12 in 1 : vector<116x16xf32>, vector<116x16xf32>, vector<116x16xf32>, vector<116x16xf32>, vector<116x16xf32> -> vector<116x80xf32>
    %c16 = arith.constant 16 : index
    %c0_5 = arith.constant 0 : index
    %14 = vector.load %arg1[%c16, %c0_5] : memref<416x128xf32, #tpu.memory_space<vmem>>, vector<80x16xf32>
    %cst_6 = arith.constant dense<0.000000e+00> : vector<116x16xf32>
    %15 = tpu.matmul %13, %14, %cst_6 {dimension_numbers = #tpu.dot_dimension_numbers<[1], [0], [0], [1], [0, 0, 1, 1], [], []>} : vector<116x80xf32>, vector<80x16xf32>, vector<116x16xf32> -> vector<116x16xf32>
    %c376 = arith.constant 376 : index
    %c0_7 = arith.constant 0 : index
    %16 = vector.load %arg1[%c376, %c0_7] : memref<416x128xf32, #tpu.memory_space<vmem>>, vector<1x16xf32>
    %17 = vector.broadcast %16 : vector<1x16xf32> to vector<116x16xf32>
    %18 = arith.addf %15, %17 : vector<116x16xf32>
    %cst_8 = arith.constant 0.000000e+00 : f32
    %19 = vector.broadcast %cst_8 : f32 to vector<116x16xf32>
    %20 = arith.maximumf %18, %19 : vector<116x16xf32>
    %c256 = arith.constant 256 : index
    %c0_9 = arith.constant 0 : index
    %21 = vector.load %arg1[%c256, %c0_9] : memref<416x128xf32, #tpu.memory_space<vmem>>, vector<36x116xf32>
    %cst_10 = arith.constant dense<0.000000e+00> : vector<36x16xf32>
    %22 = tpu.matmul %21, %20, %cst_10 {dimension_numbers = #tpu.dot_dimension_numbers<[1], [0], [0], [1], [0, 0, 1, 1], [], []>} : vector<36x116xf32>, vector<116x16xf32>, vector<36x16xf32> -> vector<36x16xf32>
    %23 = vector.extract_strided_slice %22 {offsets = [0, 0], sizes = [32, 16], strides = [1, 1]} : vector<36x16xf32> to vector<32x16xf32>
    %24 = vector.extract_strided_slice %22 {offsets = [1, 0], sizes = [32, 16], strides = [1, 1]} : vector<36x16xf32> to vector<32x16xf32>
    %25 = vector.extract_strided_slice %22 {offsets = [2, 0], sizes = [32, 16], strides = [1, 1]} : vector<36x16xf32> to vector<32x16xf32>
    %26 = vector.extract_strided_slice %22 {offsets = [3, 0], sizes = [32, 16], strides = [1, 1]} : vector<36x16xf32> to vector<32x16xf32>
    %27 = vector.extract_strided_slice %22 {offsets = [4, 0], sizes = [32, 16], strides = [1, 1]} : vector<36x16xf32> to vector<32x16xf32>
    %28 = tpu.concatenate %23, %24, %25, %26, %27 in 1 : vector<32x16xf32>, vector<32x16xf32>, vector<32x16xf32>, vector<32x16xf32>, vector<32x16xf32> -> vector<32x80xf32>
    %c96 = arith.constant 96 : index
    %c0_11 = arith.constant 0 : index
    %29 = vector.load %arg1[%c96, %c0_11] : memref<416x128xf32, #tpu.memory_space<vmem>>, vector<80x16xf32>
    %cst_12 = arith.constant dense<0.000000e+00> : vector<32x16xf32>
    %30 = tpu.matmul %28, %29, %cst_12 {dimension_numbers = #tpu.dot_dimension_numbers<[1], [0], [0], [1], [0, 0, 1, 1], [], []>} : vector<32x80xf32>, vector<80x16xf32>, vector<32x16xf32> -> vector<32x16xf32>
    %c384 = arith.constant 384 : index
    %c0_13 = arith.constant 0 : index
    %31 = vector.load %arg1[%c384, %c0_13] : memref<416x128xf32, #tpu.memory_space<vmem>>, vector<1x16xf32>
    %32 = vector.broadcast %31 : vector<1x16xf32> to vector<32x16xf32>
    %33 = arith.addf %30, %32 : vector<32x16xf32>
    %cst_14 = arith.constant 0.000000e+00 : f32
    %34 = vector.broadcast %cst_14 : f32 to vector<32x16xf32>
    %35 = arith.maximumf %33, %34 : vector<32x16xf32>
    %36 = vector.extract_strided_slice %35 {offsets = [0, 0], sizes = [28, 16], strides = [1, 1]} : vector<32x16xf32> to vector<28x16xf32>
    %37 = vector.extract_strided_slice %35 {offsets = [1, 0], sizes = [28, 16], strides = [1, 1]} : vector<32x16xf32> to vector<28x16xf32>
    %38 = vector.extract_strided_slice %35 {offsets = [2, 0], sizes = [28, 16], strides = [1, 1]} : vector<32x16xf32> to vector<28x16xf32>
    %39 = vector.extract_strided_slice %35 {offsets = [3, 0], sizes = [28, 16], strides = [1, 1]} : vector<32x16xf32> to vector<28x16xf32>
    %40 = vector.extract_strided_slice %35 {offsets = [4, 0], sizes = [28, 16], strides = [1, 1]} : vector<32x16xf32> to vector<28x16xf32>
    %41 = tpu.concatenate %36, %37, %38, %39, %40 in 1 : vector<28x16xf32>, vector<28x16xf32>, vector<28x16xf32>, vector<28x16xf32>, vector<28x16xf32> -> vector<28x80xf32>
    %c176 = arith.constant 176 : index
    %c0_15 = arith.constant 0 : index
    %42 = vector.load %arg1[%c176, %c0_15] : memref<416x128xf32, #tpu.memory_space<vmem>>, vector<80x16xf32>
    %cst_16 = arith.constant dense<0.000000e+00> : vector<28x16xf32>
    %43 = tpu.matmul %41, %42, %cst_16 {dimension_numbers = #tpu.dot_dimension_numbers<[1], [0], [0], [1], [0, 0, 1, 1], [], []>} : vector<28x80xf32>, vector<80x16xf32>, vector<28x16xf32> -> vector<28x16xf32>
    %c392 = arith.constant 392 : index
    %c0_17 = arith.constant 0 : index
    %44 = vector.load %arg1[%c392, %c0_17] : memref<416x128xf32, #tpu.memory_space<vmem>>, vector<1x16xf32>
    %45 = vector.broadcast %44 : vector<1x16xf32> to vector<28x16xf32>
    %46 = arith.addf %43, %45 : vector<28x16xf32>
    %cst_18 = arith.constant 0.000000e+00 : f32
    %47 = vector.broadcast %cst_18 : f32 to vector<28x16xf32>
    %48 = arith.maximumf %46, %47 : vector<28x16xf32>
    %c296 = arith.constant 296 : index
    %c0_19 = arith.constant 0 : index
    %49 = vector.load %arg1[%c296, %c0_19] : memref<416x128xf32, #tpu.memory_space<vmem>>, vector<4x28xf32>
    %cst_20 = arith.constant dense<0.000000e+00> : vector<4x16xf32>
    %50 = tpu.matmul %49, %48, %cst_20 {dimension_numbers = #tpu.dot_dimension_numbers<[1], [0], [0], [1], [0, 0, 1, 1], [], []>} : vector<4x28xf32>, vector<28x16xf32>, vector<4x16xf32> -> vector<4x16xf32>
    %51 = vector.extract_strided_slice %50 {offsets = [0, 0], sizes = [2, 16], strides = [1, 1]} : vector<4x16xf32> to vector<2x16xf32>
    %52 = vector.extract_strided_slice %50 {offsets = [2, 0], sizes = [2, 16], strides = [1, 1]} : vector<4x16xf32> to vector<2x16xf32>
    %53 = tpu.concatenate %51, %52 in 1 : vector<2x16xf32>, vector<2x16xf32> -> vector<2x32xf32>
    %c304 = arith.constant 304 : index
    %c0_21 = arith.constant 0 : index
    %54 = vector.load %arg1[%c304, %c0_21] : memref<416x128xf32, #tpu.memory_space<vmem>>, vector<32x32xf32>
    %cst_22 = arith.constant dense<0.000000e+00> : vector<2x32xf32>
    %55 = tpu.matmul %53, %54, %cst_22 {dimension_numbers = #tpu.dot_dimension_numbers<[1], [0], [0], [1], [0, 0, 1, 1], [], []>} : vector<2x32xf32>, vector<32x32xf32>, vector<2x32xf32> -> vector<2x32xf32>
    %c400 = arith.constant 400 : index
    %c0_23 = arith.constant 0 : index
    %56 = vector.load %arg1[%c400, %c0_23] : memref<416x128xf32, #tpu.memory_space<vmem>>, vector<1x32xf32>
    %57 = vector.broadcast %56 : vector<1x32xf32> to vector<2x32xf32>
    %58 = arith.addf %55, %57 : vector<2x32xf32>
    %cst_24 = arith.constant 0.000000e+00 : f32
    %59 = vector.broadcast %cst_24 : f32 to vector<2x32xf32>
    %60 = arith.maximumf %58, %59 : vector<2x32xf32>
    %c336 = arith.constant 336 : index
    %c0_25 = arith.constant 0 : index
    %61 = vector.load %arg1[%c336, %c0_25] : memref<416x128xf32, #tpu.memory_space<vmem>>, vector<32x10xf32>
    %cst_26 = arith.constant dense<0.000000e+00> : vector<2x10xf32>
    %62 = tpu.matmul %60, %61, %cst_26 {dimension_numbers = #tpu.dot_dimension_numbers<[1], [0], [0], [1], [0, 0, 1, 1], [], []>} : vector<2x32xf32>, vector<32x10xf32>, vector<2x10xf32> -> vector<2x10xf32>
    %c408 = arith.constant 408 : index
    %c0_27 = arith.constant 0 : index
    %63 = vector.load %arg1[%c408, %c0_27] : memref<416x128xf32, #tpu.memory_space<vmem>>, vector<1x10xf32>
    %64 = vector.broadcast %63 : vector<1x10xf32> to vector<2x10xf32>
    %65 = arith.addf %62, %64 : vector<2x10xf32>
    %c0_28 = arith.constant 0 : index
    %c0_29 = arith.constant 0 : index
    %66 = vector.load %arg2[%c0_28, %c0_29] : memref<2x10xf32, #tpu.memory_space<vmem>>, vector<2x10xf32>
    tpu.vector_store %arg2[%c0_28, %c0_29], %65 {strides = array<i32>} : memref<2x10xf32, #tpu.memory_space<vmem>>, vector<2x10xf32>,
    return
  }
}

</mosaic_0001>

<bundles_post_ra>
// kernel: tpu_custom_call.1
= control target key start
LH: loop header
LB: loop body
LE: loop exit
PB: predicated region body
PF: predicated region fallthrough
CT: control target
= control target key end

     0   :  { %7 = vsyncpa [#allocation3], 0  ;;  %s1951_s0 = inlined_call_operand.vmem [shape: f32[120,10], index: 0, kind: input, shape index: {}]   ;;  %s1952_s1 = inlined_call_operand.hbm [shape: f32[416,128], index: 1, kind: input, shape index: {}]   ;;  %s1953_s2 = inlined_call_operand.hbm [shape: f32[2,10], index: 2, kind: output, shape index: {}]  }
   0x1   :  { %8 = vsyncpa [#allocation4], 0  ;;  %s15_s11 = sshll.u32 %s1952_s1, 4  ;;  %s1298_s12 = smov [#allocation2]   ;;  %s16_s11 = int_to_ptr.hbm [resolvable:$true] %s15_s11 }
   0x2   :  { %s17_s13 = sshll.u32 %s1298_s12, 4  ;;  %s1299_s14 = smov 128   ;;  %s18_s13 = int_to_ptr.vmem [resolvable:$true] %s17_s13 }
   0x3   :  { %s1300_s15 = smov 8  }
   0x4   :  { %23 = dma.hbm_to_vmem [thread:$0]  %s16_s11, 6656, %s18_s13, [#allocation3], %s1299_s14, %s1299_s14, %s1300_s15  }
   0x5   :  { %1294 = dma.done.wait [#allocation3], 6656  }
   0x6   :  { %1295 = vsyncadd [#allocation3], 4294960640  ;;  %vm93_vm0 = vcmask 1041408   ;;  %v44_v0 = vld [vmem:[#allocation2 + $0x8] sm:$0x3]  ;;  %v43_v1 = vld [vmem:[#allocation2] sm:$0xff] }
   0x7   :  { %1171 = vmatpush.msk.msra.mxu0 %vm93_vm0, %v44_v0  ;;  %1220 = vmatpush.msk.msra.mxu3 %vm93_vm0, %v44_v0  ;;  %v28_v2 = vld [vmem:[%s1951_s0] sm:$0xff]  ;;  %vm47_vm1 = vcmask 80896   ;;  %v41_v3 = vld [vmem:[%s1951_s0 + $0x68] sm:$0xff]  ;;  %v42_v5 = vld [vmem:[%s1951_s0 + $0x70] sm:$0xff]  ;;  %vm339_vm2 = vcmask 1044480   ;;  %vm189_vm3 = vcmask 1046528  }
   0x8   :  { %v29_v4 = vld [vmem:[%s1951_s0 + $0x8] sm:$0xff]  ;;  %v30_v6 = vld [vmem:[%s1951_s0 + $0x10] sm:$0xff]  ;;  %v31_v7 = vld [vmem:[%s1951_s0 + $0x18] sm:$0xff]  ;;  %s1302_s17 = smov 16   ;;  %vm414_vm4 = vcmask 1043456   ;;  %vm264_vm5 = vcmask 1045504  }
   0x9   :  { %112 = vmatpush.msra.mxu0 %v43_v1  ;;  %1221 = vmatpush.msra.mxu3 %v43_v1  ;;  %v32_v8 = vld [vmem:[%s1951_s0 + $0x20] sm:$0xff]  ;;  %v33_v9 = vld [vmem:[%s1951_s0 + $0x28] sm:$0xff]  ;;  %v34_v10 = vld [vmem:[%s1951_s0 + $0x30] sm:$0xff]  ;;  %s1303_s1 = smov 64   ;;  %s1304_s18 = smov 32   ;;  %vm489_vm6 = vcmask 130048  }
   0xa   :  { %1172 = vmatmul.msk.f32.vlgmr.msra.gmra.mxu0 %vm47_vm1, %v28_v2  ;;  %1185 = vmatmul.msk.f32.vlgmr.msra.gmra.mxu3 %vm47_vm1, %v41_v3  ;;  %v35_v11 = vld [vmem:[%s1951_s0 + $0x38] sm:$0xff]  ;;  %v36_v12 = vld [vmem:[%s1951_s0 + $0x40] sm:$0xff]  ;;  %v37_v13 = vld [vmem:[%s1951_s0 + $0x48] sm:$0xff]  ;;  %vm521_vm7 = vcmask 392192   ;;  %vm505_vm8 = vcmask 261120   ;;  %vm537_vm9 = vcmask 523264  }
   0xb   :  { %v38_v14 = vld [vmem:[%s1951_s0 + $0x50] sm:$0xff]  ;;  %v39_v15 = vld [vmem:[%s1951_s0 + $0x58] sm:$0xff]  ;;  %v40_v16 = vld [vmem:[%s1951_s0 + $0x60] sm:$0xff]  ;;  %s1301_s0 = smov 48   ;;  %vm565_vm10 = vcmask 654336   ;;  %vm693_vm11 = vcmask 949248  }
   0xc   :  { %v1384_v17 = vld [vmem:[#allocation2 + $0x170] ss:$0 sm:$0xff]  ;;  %vm1060_vm12 = vcmask 228352   ;;  %s1305_s19 = smov [#allocation5]   ;;  %s1161_s23 = sshll.u32 %s1953_s2, 4  ;;  %vm1152_vm13 = vcmask 74752   ;;  %s1162_s23 = int_to_ptr.hbm [resolvable:$true] %s1161_s23 }
   0xd   :  { %s1159_s20 = sshll.u32 %s1305_s19, 4  ;;  %s1160_s20 = int_to_ptr.vmem [resolvable:$true] %s1159_s20 }
  0x12   :  { %1173 = vmatmul.msk.f32.gmra.mxu0 %vm47_vm1, %v29_v4  ;;  %1186 = vmatmul.msk.f32.gmra.mxu3 %vm47_vm1, %v42_v5 }
  0x1a   :  { %1174 = vmatmul.msk.f32.gmra.mxu0 %vm47_vm1, %v30_v6 }
  0x22   :  { %1175 = vmatmul.msk.f32.gmra.mxu0 %vm47_vm1, %v31_v7 }
  0x2a   :  { %1176 = vmatmul.msk.f32.gmra.mxu0 %vm47_vm1, %v32_v8 }
  0x32   :  { %1177 = vmatmul.msk.f32.gmra.mxu0 %vm47_vm1, %v33_v9 }
  0x3a   :  { %1178 = vmatmul.msk.f32.gmra.mxu0 %vm47_vm1, %v34_v10 }
  0x42   :  { %1179 = vmatmul.msk.f32.gmra.mxu0 %vm47_vm1, %v35_v11 }
  0x4a   :  { %1180 = vmatmul.msk.f32.gmra.mxu0 %vm47_vm1, %v36_v12 }
  0x52   :  { %1181 = vmatmul.msk.f32.gmra.mxu0 %vm47_vm1, %v37_v13 }
  0x5a   :  { %1182 = vmatmul.msk.f32.gmra.mxu0 %vm47_vm1, %v38_v14 }
  0x62   :  { %1183 = vmatmul.msk.f32.gmra.mxu0 %vm47_vm1, %v39_v15 }
  0x6a   :  { %1184 = vmatmul.msk.f32.gmra.mxu0 %vm47_vm1, %v40_v16 }
  0x87   :  { %v114_v18 = vpop.f32.mrf.mxu0 }
  0x88   :  { %v115_v19 = vadd.f32 %v1384_v17, %v114_v18 }
  0x8a   :  { %v1387_v21 = vmax.f32 %v115_v19, 0.0 }
  0x8c   :  { %v340_v26 = vrot.slane %v1387_v21, 3  ;;  %v190_v29 = vrot.slane %v1387_v21, 1  ;;  %v415_v44 = vrot.slane %v1387_v21, 4  ;;  %v265_v45 = vrot.slane %v1387_v21, 2 }
  0x8d   :  { %v153_v20 = vpop.f32.mrf.mxu3 }
  0x8e   :  { %v154_v23 = vadd.f32 %v1384_v17, %v153_v20 }
  0x8f   :  { %v117_v22 = vpop.f32.mrf.mxu0 }
  0x90   :  { %v118_v24 = vadd.f32 %v1384_v17, %v117_v22  ;;  %v1394_v27 = vmax.f32 %v154_v23, 0.0 }
  0x92   :  { %v1391_v25 = vmax.f32 %v118_v24, 0.0  ;;  %v215_v38 = vrot.slane %v1394_v27, 1  ;;  %v365_v50 = vrot.slane %v1394_v27, 3  ;;  %v290_v57 = vrot.slane %v1394_v27, 2 }
  0x93   :  { %v440_v3 = vrot.slane %v1394_v27, 4 }
  0x94   :  { %v341_v28 = vrot.slane %v1391_v25, 3  ;;  %v191_v30 = vrot.slane %v1391_v25, 1  ;;  %v416_v40 = vrot.slane %v1391_v25, 4  ;;  %v266_v41 = vrot.slane %v1391_v25, 2 }
  0x95   :  { %v156_v31 = vpop.f32.mrf.mxu3 }
  0x96   :  { %v157_v32 = vadd.f32 %v1384_v17, %v156_v31  ;;  %v342_v33 = vsel %vm339_vm2, %v340_v26, %v341_v28  ;;  %v192_v34 = vsel %vm189_vm3, %v190_v29, %v191_v30  ;;  %v417_v46 = vsel %vm414_vm4, %v415_v44, %v416_v40 }
  0x97   :  { %v120_v35 = vpop.f32.mrf.mxu0  ;;  %369 = vrot.lane.b32.xlu1 %v342_v33, %s1301_s0  ;;  %219 = vrot.lane.b32.xlu0 %v192_v34, %s1302_s17  ;;  %v267_v47 = vsel %vm264_vm5, %v265_v45, %v266_v41 }
  0x98   :  { %v1404_v36 = vmax.f32 %v157_v32, 0.0  ;;  %v121_v37 = vadd.f32 %v1384_v17, %v120_v35 }
  0x9a   :  { %v217_v39 = vrot.slane %v1404_v36, 1  ;;  %v1411_v42 = vmax.f32 %v121_v37, 0.0  ;;  %v367_v51 = vrot.slane %v1404_v36, 3  ;;  %v292_v58 = vrot.slane %v1404_v36, 2 }
  0x9b   :  { %v442_v4 = vrot.slane %v1404_v36, 4 }
  0x9c   :  { %v218_v43 = vsel %vm189_vm3, %v215_v38, %v217_v39  ;;  %v193_v49 = vrot.slane %v1411_v42, 1  ;;  %v368_v53 = vsel %vm339_vm2, %v365_v50, %v367_v51  ;;  %v268_v56 = vrot.slane %v1411_v42, 2 }
  0x9d   :  { %245 = vrot.lane.b32.xlu2 %v218_v43, %s1302_s17  ;;  %v343_v59 = vrot.slane %v1411_v42, 3  ;;  %v293_v62 = vsel %vm264_vm5, %v290_v57, %v292_v58  ;;  %v443_v8 = vsel %vm414_vm4, %v440_v3, %v442_v4  ;;  %v418_v12 = vrot.slane %v1411_v42, 4 }
  0x9e   :  { %v194_v52 = vsel %vm189_vm3, %v191_v30, %v193_v49  ;;  %v269_v61 = vsel %vm264_vm5, %v266_v41, %v268_v56 }
  0x9f   :  { %v123_v48 = vpop.f32.mrf.mxu0  ;;  %444 = vrot.lane.b32.xlu1 %v417_v46, %s1303_s1  ;;  %294 = vrot.lane.b32.xlu0 %v267_v47, %s1304_s18  ;;  %v344_v63 = vsel %vm339_vm2, %v341_v28, %v343_v59  ;;  %v419_v15 = vsel %vm414_vm4, %v416_v40, %v418_v12 }
  0xa0   :  { %v124_v55 = vadd.f32 %v1384_v17, %v123_v48 }
  0xa2   :  { %v1440_v60 = vmax.f32 %v124_v55, 0.0 }
  0xa4   :  { %v195_v1 = vrot.slane %v1440_v60, 1  ;;  %v270_v5 = vrot.slane %v1440_v60, 2  ;;  %v420_v11 = vrot.slane %v1440_v60, 4  ;;  %v345_v22 = vrot.slane %v1440_v60, 3 }
  0xa5   :  { %221 = vrot.lane.b32.xlu2 %v194_v52, %s1302_s17 }
  0xa6   :  { %v196_v6 = vsel %vm189_vm3, %v193_v49, %v195_v1  ;;  %v271_v9 = vsel %vm264_vm5, %v268_v56, %v270_v5  ;;  %v421_v14 = vsel %vm414_vm4, %v418_v12, %v420_v11  ;;  %v346_v28 = vsel %vm339_vm2, %v343_v59, %v345_v22 }
  0xa7   :  { %v126_v54 = vpop.f32.mrf.mxu0  ;;  %247 = vrot.lane.b32.xlu1 %v217_v39, %s1302_s17  ;;  %395 = vrot.lane.b32.xlu0 %v368_v53, %s1301_s0 }
  0xa8   :  { %v127_v2 = vadd.f32 %v1384_v17, %v126_v54 }
  0xaa   :  { %v1459_v7 = vmax.f32 %v127_v2, 0.0 }
  0xac   :  { %v197_v13 = vrot.slane %v1459_v7, 1  ;;  %v347_v20 = vrot.slane %v1459_v7, 3  ;;  %v422_v23 = vrot.slane %v1459_v7, 4  ;;  %v272_v33 = vrot.slane %v1459_v7, 2 }
  0xad   :  { %296 = vrot.lane.b32.xlu2 %v269_v61, %s1304_s18 }
  0xae   :  { %v198_v16 = vsel %vm189_vm3, %v195_v1, %v197_v13  ;;  %v348_v26 = vsel %vm339_vm2, %v345_v22, %v347_v20  ;;  %v423_v29 = vsel %vm414_vm4, %v420_v11, %v422_v23  ;;  %v273_v39 = vsel %vm264_vm5, %v270_v5, %v272_v33  ;;  %v562_v5 = vld [vmem:[#allocation2 + $0x58] sm:$0xff]  ;;  %v560_v11 = vld [vmem:[#allocation2 + $0x48] sm:$0xff]  ;;  %v557_v22 = vld [vmem:[#allocation2 + $0x30] sm:$0xff] }
  0xaf   :  { %v129_v0 = vpop.f32.mrf.mxu0  ;;  %320 = vrot.lane.b32.xlu1 %v293_v62, %s1304_s18  ;;  %371 = vrot.lane.b32.xlu0 %v344_v63, %s1301_s0 }
  0xb0   :  { %v130_v19 = vadd.f32 %v1384_v17, %v129_v0  ;;  %617 = vmatpush.msra.mxu1 %v562_v5  ;;  %1222 = vmatpush.msra.mxu2 %v562_v5 }
  0xb2   :  { %v1482_v24 = vmax.f32 %v130_v19, 0.0 }
  0xb4   :  { %v274_v31 = vrot.slane %v1482_v24, 2  ;;  %v349_v34 = vrot.slane %v1482_v24, 3  ;;  %v199_v44 = vrot.slane %v1482_v24, 1  ;;  %v424_v55 = vrot.slane %v1482_v24, 4 }
  0xb5   :  { %223 = vrot.lane.b32.xlu2 %v196_v6, %s1302_s17  ;;  %v561_v6 = vld [vmem:[#allocation2 + $0x50] sm:$0xff] }
  0xb6   :  { %v275_v37 = vsel %vm264_vm5, %v272_v33, %v274_v31  ;;  %v350_v40 = vsel %vm339_vm2, %v347_v20, %v349_v34  ;;  %v200_v49 = vsel %vm189_vm3, %v197_v13, %v199_v44  ;;  %v425_v0 = vsel %vm414_vm4, %v422_v23, %v424_v55  ;;  %618 = vmatpush.msra.mxu1 %v561_v6  ;;  %v558_v20 = vld [vmem:[#allocation2 + $0x38] sm:$0xff]  ;;  %v555_v33 = vld [vmem:[#allocation2 + $0x20] sm:$0xff] }
  0xb7   :  { %v132_v10 = vpop.f32.mrf.mxu0  ;;  %470 = vrot.lane.b32.xlu1 %v443_v8, %s1303_s1  ;;  %298 = vrot.lane.b32.xlu0 %v271_v9, %s1304_s18 }
  0xb8   :  { %v133_v30 = vadd.f32 %v1384_v17, %v132_v10  ;;  %1223 = vmatpush.msra.mxu2 %v561_v6  ;;  %619 = vmatpush.msra.mxu1 %v560_v11 }
  0xba   :  { %v1494_v35 = vmax.f32 %v133_v30, 0.0  ;;  %1224 = vmatpush.msra.mxu2 %v560_v11 }
  0xbc   :  { %v201_v41 = vrot.slane %v1494_v35, 1  ;;  %v276_v45 = vrot.slane %v1494_v35, 2  ;;  %v351_v53 = vrot.slane %v1494_v35, 3  ;;  %v426_v61 = vrot.slane %v1494_v35, 4 }
  0xbd   :  { %448 = vrot.lane.b32.xlu2 %v421_v14, %s1303_s1 }
  0xbe   :  { %v202_v47 = vsel %vm189_vm3, %v199_v44, %v201_v41  ;;  %v277_v52 = vsel %vm264_vm5, %v274_v31, %v276_v45  ;;  %v352_v59 = vsel %vm339_vm2, %v349_v34, %v351_v53  ;;  %v427_v12 = vsel %vm414_vm4, %v424_v55, %v426_v61 }
  0xbf   :  { %v135_v18 = vpop.f32.mrf.mxu0  ;;  %446 = vrot.lane.b32.xlu1 %v419_v15, %s1303_s1  ;;  %225 = vrot.lane.b32.xlu0 %v198_v16, %s1302_s17 }
  0xc0   :  { %v136_v43 = vadd.f32 %v1384_v17, %v135_v18  ;;  %v559_v18 = vld [vmem:[#allocation2 + $0x40] sm:$0xff] }
  0xc1   :  { %620 = vmatpush.msra.mxu1 %v559_v18  ;;  %1225 = vmatpush.msra.mxu2 %v559_v18 }
  0xc2   :  { %v1508_v48 = vmax.f32 %v136_v43, 0.0 }
  0xc3   :  { %621 = vmatpush.msra.mxu1 %v558_v20  ;;  %1226 = vmatpush.msra.mxu2 %v558_v20 }
  0xc4   :  { %v428_v56 = vrot.slane %v1508_v48, 4  ;;  %v278_v2 = vrot.slane %v1508_v48, 2  ;;  %v203_v10 = vrot.slane %v1508_v48, 1 }
  0xc5   :  { %375 = vrot.lane.b32.xlu2 %v348_v26, %s1301_s0  ;;  %622 = vmatpush.msra.mxu1 %v557_v22 }
  0xc6   :  { %v429_v1 = vsel %vm414_vm4, %v426_v61, %v428_v56  ;;  %v279_v9 = vsel %vm264_vm5, %v276_v45, %v278_v2  ;;  %v204_v30 = vsel %vm189_vm3, %v201_v41, %v203_v10  ;;  %1227 = vmatpush.msra.mxu2 %v557_v22 }
  0xc7   :  { %373 = vrot.lane.b32.xlu1 %v346_v28, %s1301_s0  ;;  %450 = vrot.lane.b32.xlu0 %v423_v29, %s1303_s1  ;;  %v138_v32 = vpop.f32.mrf.mxu0  ;;  %v353_v28 = vrot.slane %v1508_v48, 3  ;;  %v556_v29 = vld [vmem:[#allocation2 + $0x28] sm:$0xff] }
  0xc8   :  { %v139_v54 = vadd.f32 %v1384_v17, %v138_v32  ;;  %623 = vmatpush.msra.mxu1 %v556_v29  ;;  %1228 = vmatpush.msra.mxu2 %v556_v29 }
  0xca   :  { %v1525_v63 = vmax.f32 %v139_v54, 0.0  ;;  %624 = vmatpush.msra.mxu1 %v555_v33  ;;  %1229 = vmatpush.msra.mxu2 %v555_v33 }
  0xcc   :  { %v205_v8 = vrot.slane %v1525_v63, 1  ;;  %v430_v16 = vrot.slane %v1525_v63, 4  ;;  %v355_v19 = vrot.slane %v1525_v63, 3  ;;  %v280_v45 = vrot.slane %v1525_v63, 2 }
  0xcd   :  { %302 = vrot.lane.b32.xlu2 %v275_v37, %s1304_s18 }
  0xce   :  { %v206_v13 = vsel %vm189_vm3, %v203_v10, %v205_v8  ;;  %v431_v26 = vsel %vm414_vm4, %v428_v56, %v430_v16  ;;  %v356_v31 = vsel %vm339_vm2, %v353_v28, %v355_v19  ;;  %v281_v61 = vsel %vm264_vm5, %v278_v2, %v280_v45 }
  0xcf   :  { %300 = vrot.lane.b32.xlu1 %v273_v39, %s1304_s18  ;;  %377 = vrot.lane.b32.xlu0 %v350_v40, %s1301_s0  ;;  %v141_v46 = vpop.f32.mrf.mxu0  ;;  %v554_v39 = vld [vmem:[#allocation2 + $0x18] sm:$0xff]  ;;  %v553_v40 = vld [vmem:[#allocation2 + $0x10] sm:$0xff] }
  0xd0   :  { %v142_v15 = vadd.f32 %v1384_v17, %v141_v46  ;;  %625 = vmatpush.msra.mxu1 %v554_v39  ;;  %1230 = vmatpush.msra.mxu2 %v554_v39  ;;  %v354_v46 = vsel %vm339_vm2, %v351_v53, %v353_v28 }
  0xd2   :  { %v1545_v23 = vmax.f32 %v142_v15, 0.0  ;;  %626 = vmatpush.msra.mxu1 %v553_v40  ;;  %1231 = vmatpush.msra.mxu2 %v553_v40 }
  0xd4   :  { %v207_v32 = vrot.slane %v1545_v23, 1  ;;  %v282_v37 = vrot.slane %v1545_v23, 2  ;;  %v357_v55 = vrot.slane %v1545_v23, 3 }
  0xd5   :  { %229 = vrot.lane.b32.xlu2 %v202_v47, %s1302_s17 }
  0xd6   :  { %v208_v44 = vsel %vm189_vm3, %v205_v8, %v207_v32  ;;  %v283_v47 = vsel %vm264_vm5, %v280_v45, %v282_v37  ;;  %v358_v53 = vsel %vm339_vm2, %v355_v19, %v357_v55 }
  0xd7   :  { %227 = vrot.lane.b32.xlu1 %v200_v49, %s1302_s17  ;;  %304 = vrot.lane.b32.xlu0 %v277_v52, %s1304_s18  ;;  %v1522_v62 = vpop.f32.mrf.mxu0 }
  0xdd   :  { %379 = vrot.lane.b32.xlu2 %v352_v59, %s1301_s0 }
  0xdf   :  { %452 = vrot.lane.b32.xlu1 %v425_v0, %s1303_s1  ;;  %456 = vrot.lane.b32.xlu0 %v429_v1, %s1303_s1  ;;  %v147_v14 = vpop.f32.mrf.mxu0 }
  0xe0   :  { %v148_v41 = vadd.f32 %v1384_v17, %v147_v14 }
  0xe2   :  { %v1575_v52 = vmax.f32 %v148_v41, 0.0 }
  0xe4   :  { %v286_v56 = vrot.slane %v1575_v52, 2  ;;  %v361_v5 = vrot.slane %v1575_v52, 3  ;;  %v211_v8 = vrot.slane %v1575_v52, 1  ;;  %v436_v10 = vrot.slane %v1575_v52, 4 }
  0xe5   :  { %306 = vrot.lane.b32.xlu2 %v279_v9, %s1304_s18 }
  0xe7   :  { %454 = vrot.lane.b32.xlu1 %v427_v12, %s1303_s1  ;;  %233 = vrot.lane.b32.xlu0 %v206_v13, %s1302_s17  ;;  %v150_v34 = vpop.f32.mrf.mxu0 }
  0xe8   :  { %v151_v43 = vadd.f32 %v1384_v17, %v150_v34 }
  0xea   :  { %v1577_v54 = vmax.f32 %v151_v43, 0.0 }
  0xec   :  { %v288_v59 = vrot.slane %v1577_v54, 2  ;;  %v363_v6 = vrot.slane %v1577_v54, 3  ;;  %v213_v9 = vrot.slane %v1577_v54, 1  ;;  %v438_v11 = vrot.slane %v1577_v54, 4 }
  0xed   :  { %458 = vrot.lane.b32.xlu2 %v431_v26, %s1303_s1 }
  0xee   :  { %v289_v0 = vsel %vm264_vm5, %v286_v56, %v288_v59  ;;  %v364_v2 = vsel %vm339_vm2, %v361_v5, %v363_v6  ;;  %v214_v12 = vsel %vm189_vm3, %v211_v8, %v213_v9  ;;  %v439_v13 = vsel %vm414_vm4, %v436_v10, %v438_v11 }
  0xef   :  { %231 = vrot.lane.b32.xlu1 %v204_v30, %s1302_s17  ;;  %383 = vrot.lane.b32.xlu0 %v356_v31, %s1301_s0  ;;  %v291_v19 = vsel %vm264_vm5, %v288_v59, %v290_v57  ;;  %v366_v20 = vsel %vm339_vm2, %v363_v6, %v365_v50  ;;  %v216_v22 = vsel %vm189_vm3, %v213_v9, %v215_v38  ;;  %v432_v30 = vrot.slane %v1545_v23, 4 }
  0xf0   :  { %v145_v50 = vadd.f32 %v1384_v17, %v1522_v62  ;;  %v441_v33 = vsel %vm414_vm4, %v438_v11, %v440_v3 }
  0xf1   :  { %v433_v17 = vsel %vm414_vm4, %v430_v16, %v432_v30 }
  0xf5   :  { %235 = vrot.lane.b32.xlu2 %v208_v44, %s1302_s17 }
  0xf7   :  { %v1571_v49 = vpop.permute.xlu2 %245  ;;  %381 = vrot.lane.b32.xlu1 %v354_v46, %s1301_s0  ;;  %310 = vrot.lane.b32.xlu0 %v283_v47, %s1304_s18 }
  0xf8   :  { %v503_v43 = vsel %vm489_vm6, %v1394_v27, %v1571_v49 }
  0xfd   :  { %385 = vrot.lane.b32.xlu2 %v358_v53, %s1301_s0 }
  0xff   :  { %v1592_v1 = vpop.permute.xlu2 %221  ;;  %308 = vrot.lane.b32.xlu1 %v281_v61, %s1304_s18  ;;  %316 = vrot.lane.b32.xlu0 %v289_v0, %s1304_s18 }
 0x105   :  { %391 = vrot.lane.b32.xlu2 %v364_v2, %s1301_s0  ;;  %v491_v2 = vsel %vm489_vm6, %v1391_v25, %v1592_v1 }
 0x107   :  { %v1612_v14 = vpop.permute.xlu2 %296  ;;  %241 = vrot.lane.b32.xlu1 %v214_v12, %s1302_s17  ;;  %466 = vrot.lane.b32.xlu0 %v439_v13, %s1303_s1 }
 0x109   :  { %v370_v15 = vpop.permute.xlu1 %369  ;;  %v220_v18 = vpop.permute.xlu0 %219 }
 0x10a   :  { %v490_v57 = vsel %vm489_vm6, %v1387_v21, %v220_v18  ;;  %v1643_v21 = vmax.f32 %v145_v50, 0.0 }
 0x10c   :  { %v209_v40 = vrot.slane %v1643_v21, 1  ;;  %v434_v46 = vrot.slane %v1643_v21, 4 }
 0x10d   :  { %318 = vrot.lane.b32.xlu2 %v291_v19, %s1304_s18 }
 0x10e   :  { %v210_v16 = vsel %vm189_vm3, %v207_v32, %v209_v40  ;;  %v359_v32 = vrot.slane %v1643_v21, 3  ;;  %v435_v53 = vsel %vm414_vm4, %v432_v30, %v434_v46  ;;  %v437_v25 = vsel %vm414_vm4, %v434_v46, %v436_v10 }
 0x10f   :  { %v1626_v26 = vpop.permute.xlu2 %223  ;;  %393 = vrot.lane.b32.xlu1 %v366_v20, %s1301_s0  ;;  %243 = vrot.lane.b32.xlu0 %v216_v22, %s1302_s17 }
 0x110   :  { %v360_v27 = vsel %vm339_vm2, %v357_v55, %v359_v32  ;;  %v362_v55 = vsel %vm339_vm2, %v359_v32, %v361_v5  ;;  %v492_v1 = vsel %vm489_vm6, %v1411_v42, %v1626_v26 }
 0x111   :  { %v445_v28 = vpop.permute.xlu1 %444  ;;  %v295_v29 = vpop.permute.xlu0 %294 }
 0x112   :  { %v506_v38 = vsel %vm505_vm8, %v490_v57, %v295_v29 }
 0x113   :  { %v522_v31 = vsel %vm521_vm7, %v506_v38, %v370_v15 }
 0x114   :  { %v538_v34 = vsel %vm537_vm9, %v522_v31, %v445_v28 }
 0x115   :  { %468 = vrot.lane.b32.xlu2 %v441_v33, %s1303_s1  ;;  %1187 = vmatmul.msk.f32.vlgmr.msra.gmra.mxu1 %vm565_vm10, %v538_v34 }
 0x117   :  { %v449_v62 = vpop.permute.xlu2 %448  ;;  %460 = vrot.lane.b32.xlu1 %v433_v17, %s1303_s1  ;;  %322 = vrot.lane.b32.xlu0 %v292_v58, %s1304_s18  ;;  %v284_v58 = vrot.slane %v1643_v21, 2 }
 0x119   :  { %v1652_v3 = vpop.permute.xlu1 %247  ;;  %v396_v39 = vpop.permute.xlu0 %395  ;;  %v287_v6 = vsel %vm264_vm5, %v284_v58, %v286_v56 }
 0x11d   :  { %397 = vrot.lane.b32.xlu2 %v367_v51, %s1301_s0 }
 0x11f   :  { %v376_v41 = vpop.permute.xlu2 %375  ;;  %237 = vrot.lane.b32.xlu1 %v210_v16, %s1302_s17  ;;  %472 = vrot.lane.b32.xlu0 %v442_v4, %s1303_s1  ;;  %v285_v4 = vsel %vm264_vm5, %v282_v37, %v284_v58  ;;  %v212_v37 = vsel %vm189_vm3, %v209_v40, %v211_v8  ;;  %v507_v8 = vsel %vm505_vm8, %v491_v2, %v1612_v14 }
 0x121   :  { %v321_v44 = vpop.permute.xlu1 %320  ;;  %v372_v45 = vpop.permute.xlu0 %371 }
 0x122   :  { %v519_v51 = vsel %vm505_vm8, %v503_v43, %v321_v44  ;;  %v523_v11 = vsel %vm521_vm7, %v507_v8, %v372_v45 }
 0x123   :  { %v535_v47 = vsel %vm521_vm7, %v519_v51, %v396_v39 }
 0x125   :  { %312 = vrot.lane.b32.xlu2 %v285_v4, %s1304_s18 }
 0x127   :  { %v303_v49 = vpop.permute.xlu2 %302  ;;  %462 = vrot.lane.b32.xlu1 %v435_v53, %s1303_s1  ;;  %387 = vrot.lane.b32.xlu0 %v360_v27, %s1301_s0 }
 0x129   :  { %v471_v59 = vpop.permute.xlu1 %470  ;;  %v299_v61 = vpop.permute.xlu0 %298 }
 0x12a   :  { %v1684_v0 = vsel %vm537_vm9, %v535_v47, %v471_v59  ;;  %v508_v14 = vsel %vm505_vm8, %v492_v1, %v299_v61 }
 0x12d   :  { %239 = vrot.lane.b32.xlu2 %v212_v37, %s1302_s17 }
 0x12f   :  { %v230_v9 = vpop.permute.xlu2 %229  ;;  %389 = vrot.lane.b32.xlu1 %v362_v55, %s1301_s0  ;;  %314 = vrot.lane.b32.xlu0 %v287_v6, %s1304_s18 }
 0x130   :  { %v495_v40 = vsel %vm489_vm6, %v1482_v24, %v230_v9 }
 0x131   :  { %v447_v12 = vpop.permute.xlu1 %446  ;;  %v226_v5 = vpop.permute.xlu0 %225 }
 0x132   :  { %v539_v13 = vsel %vm537_vm9, %v523_v11, %v447_v12  ;;  %v493_v10 = vsel %vm489_vm6, %v1440_v60, %v226_v5 }
 0x133   :  { %1188 = vmatmul.msk.f32.gmra.mxu1 %vm565_vm10, %v539_v13 }
 0x135   :  { %464 = vrot.lane.b32.xlu2 %v437_v25, %s1303_s1 }
 0x137   :  { %v380_v56 = vpop.permute.xlu2 %379 }
 0x139   :  { %v374_v15 = vpop.permute.xlu1 %373  ;;  %v451_v18 = vpop.permute.xlu0 %450 }
 0x13a   :  { %v524_v19 = vsel %vm521_vm7, %v508_v14, %v374_v15 }
 0x13b   :  { %v540_v20 = vsel %vm537_vm9, %v524_v19, %v449_v62 }
 0x13c   :  { %1189 = vmatmul.msk.f32.gmra.mxu1 %vm565_vm10, %v540_v20 }
 0x13f   :  { %v307_v22 = vpop.permute.xlu2 %306 }
 0x141   :  { %v301_v57 = vpop.permute.xlu1 %300  ;;  %v378_v28 = vpop.permute.xlu0 %377 }
 0x142   :  { %v509_v29 = vsel %vm505_vm8, %v493_v10, %v301_v57 }
 0x143   :  { %v525_v42 = vsel %vm521_vm7, %v509_v29, %v376_v41 }
 0x144   :  { %v541_v26 = vsel %vm537_vm9, %v525_v42, %v451_v18 }
 0x145   :  { %1190 = vmatmul.msk.f32.gmra.mxu1 %vm565_vm10, %v541_v26 }
 0x147   :  { %v459_v50 = vpop.permute.xlu2 %458 }
 0x149   :  { %v228_v38 = vpop.permute.xlu1 %227  ;;  %v305_v30 = vpop.permute.xlu0 %304 }
 0x14a   :  { %v494_v31 = vsel %vm489_vm6, %v1459_v7, %v228_v38  ;;  %v511_v16 = vsel %vm505_vm8, %v495_v40, %v305_v30 }
 0x14b   :  { %v510_v33 = vsel %vm505_vm8, %v494_v31, %v303_v49  ;;  %v527_v7 = vsel %vm521_vm7, %v511_v16, %v380_v56 }
 0x14c   :  { %v526_v17 = vsel %vm521_vm7, %v510_v33, %v378_v28 }
 0x14f   :  { %v236_v62 = vpop.permute.xlu2 %235 }
 0x151   :  { %v453_v34 = vpop.permute.xlu1 %452  ;;  %v457_v60 = vpop.permute.xlu0 %456 }
 0x152   :  { %v542_v39 = vsel %vm537_vm9, %v526_v17, %v453_v34 }
 0x153   :  { %1191 = vmatmul.msk.f32.gmra.mxu1 %vm565_vm10, %v542_v39 }
 0x157   :  { %v386_v44 = vpop.permute.xlu2 %385 }
 0x159   :  { %v455_v41 = vpop.permute.xlu1 %454  ;;  %v234_v58 = vpop.permute.xlu0 %233 }
 0x15a   :  { %v543_v43 = vsel %vm537_vm9, %v527_v7, %v455_v41  ;;  %v497_v59 = vsel %vm489_vm6, %v1508_v48, %v234_v58 }
 0x15b   :  { %1192 = vmatmul.msk.f32.gmra.mxu1 %vm565_vm10, %v543_v43 }
 0x15f   :  { %v392_v46 = vpop.permute.xlu2 %391 }
 0x161   :  { %v232_v45 = vpop.permute.xlu1 %231  ;;  %v384_v51 = vpop.permute.xlu0 %383 }
 0x162   :  { %v496_v32 = vsel %vm489_vm6, %v1494_v35, %v232_v45 }
 0x163   :  { %v512_v47 = vsel %vm505_vm8, %v496_v32, %v307_v22 }
 0x167   :  { %v319_v49 = vpop.permute.xlu2 %318 }
 0x169   :  { %v382_v24 = vpop.permute.xlu1 %381  ;;  %v311_v4 = vpop.permute.xlu0 %310 }
 0x16a   :  { %v528_v53 = vsel %vm521_vm7, %v512_v47, %v382_v24  ;;  %v1241_v24 = vld [vmem:[#allocation2 + $0x178] ss:$0 sm:$0xff] }
 0x16b   :  { %v544_v27 = vsel %vm537_vm9, %v528_v53, %v457_v60 }
 0x16c   :  { %1193 = vmatmul.msk.f32.gmra.mxu1 %vm565_vm10, %v544_v27 }
 0x16f   :  { %v469_v8 = vpop.permute.xlu2 %468 }
 0x171   :  { %v309_v61 = vpop.permute.xlu1 %308  ;;  %v317_v37 = vpop.permute.xlu0 %316 }
 0x172   :  { %v513_v55 = vsel %vm505_vm8, %v497_v59, %v309_v61 }
 0x173   :  { %v529_v35 = vsel %vm521_vm7, %v513_v55, %v384_v51 }
 0x174   :  { %v545_v6 = vsel %vm537_vm9, %v529_v35, %v459_v50 }
 0x175   :  { %1194 = vmatmul.msk.f32.gmra.mxu1 %vm565_vm10, %v545_v6 }
 0x177   :  { %v398_v14 = vpop.permute.xlu2 %397 }
 0x179   :  { %v242_v2 = vpop.permute.xlu1 %241  ;;  %v467_v9 = vpop.permute.xlu0 %466 }
 0x17a   :  { %v501_v11 = vsel %vm489_vm6, %v1575_v52, %v242_v2  ;;  %v498_v52 = vsel %vm489_vm6, %v1525_v63, %v236_v62  ;;  %v504_v63 = vsel %vm489_vm6, %v1404_v36, %v1652_v3 }
 0x17b   :  { %v517_v12 = vsel %vm505_vm8, %v501_v11, %v317_v37  ;;  %v514_v19 = vsel %vm505_vm8, %v498_v52, %v311_v4 }
 0x17c   :  { %v533_v48 = vsel %vm521_vm7, %v517_v12, %v392_v46  ;;  %v530_v10 = vsel %vm521_vm7, %v514_v19, %v386_v44 }
 0x17d   :  { %v549_v5 = vsel %vm537_vm9, %v533_v48, %v467_v9 }
 0x17e   :  { %1198 = vmatmul.msk.f32.vlgmr.msra.gmra.mxu2 %vm565_vm10, %v549_v5 }
 0x17f   :  { %v313_v57 = vpop.permute.xlu2 %312 }
 0x181   :  { %v394_v13 = vpop.permute.xlu1 %393  ;;  %v244_v25 = vpop.permute.xlu0 %243 }
 0x182   :  { %v502_v56 = vsel %vm489_vm6, %v1577_v54, %v244_v25 }
 0x183   :  { %v518_v1 = vsel %vm505_vm8, %v502_v56, %v319_v49 }
 0x184   :  { %v534_v15 = vsel %vm521_vm7, %v518_v1, %v394_v13 }
 0x185   :  { %v550_v18 = vsel %vm537_vm9, %v534_v15, %v469_v8 }
 0x186   :  { %1199 = vmatmul.msk.f32.gmra.mxu2 %vm565_vm10, %v550_v18 }
 0x187   :  { %v240_v30 = vpop.permute.xlu2 %239 }
 0x188   :  { %v500_v34 = vsel %vm489_vm6, %v1643_v21, %v240_v30 }
 0x189   :  { %v461_v20 = vpop.permute.xlu1 %460  ;;  %v323_v22 = vpop.permute.xlu0 %322 }
 0x18a   :  { %v546_v54 = vsel %vm537_vm9, %v530_v10, %v461_v20  ;;  %v520_v28 = vsel %vm505_vm8, %v504_v63, %v323_v22 }
 0x18b   :  { %1195 = vmatmul.msk.f32.gmra.mxu1 %vm565_vm10, %v546_v54  ;;  %v536_v26 = vsel %vm521_vm7, %v520_v28, %v398_v14 }
 0x18e   :  { %1200 = vmatmul.msk.f32.gmra.mxu2 %vm565_vm10, %v1684_v0 }
 0x18f   :  { %v465_v62 = vpop.permute.xlu2 %464 }
 0x191   :  { %v238_v29 = vpop.permute.xlu1 %237  ;;  %v473_v42 = vpop.permute.xlu0 %472 }
 0x192   :  { %v552_v50 = vsel %vm537_vm9, %v536_v26, %v473_v42  ;;  %v499_v38 = vsel %vm489_vm6, %v1545_v23, %v238_v29  ;;  %v628_v16 = vpop.f32.mrf.mxu1  ;;  %v688_v29 = vld [vmem:[#allocation2 + $0x100] sm:$0xff]  ;;  %v689_v42 = vld [vmem:[#allocation2 + $0x108] sm:$0xff]  ;;  %v690_v26 = vld [vmem:[#allocation2 + $0x110] sm:$0xff] }
 0x193   :  { %v515_v0 = vsel %vm505_vm8, %v499_v38, %v313_v57  ;;  %v629_v54 = vadd.f32 %v1241_v24, %v628_v16  ;;  %v692_v38 = vld [vmem:[#allocation2 + $0x120] sm:$0xf] }
 0x195   :  { %v673_v28 = vmax.f32 %v629_v54, 0.0 }
 0x196   :  { %1201 = vmatmul.msk.f32.gmra.mxu2 %vm565_vm10, %v552_v50  ;;  %v691_v50 = vld [vmem:[#allocation2 + $0x118] sm:$0xff] }
 0x199   :  { %v463_v31 = vpop.permute.xlu1 %462  ;;  %v388_v33 = vpop.permute.xlu0 %387 }
 0x19a   :  { %v531_v36 = vsel %vm521_vm7, %v515_v0, %v388_v33 }
 0x19b   :  { %v547_v3 = vsel %vm537_vm9, %v531_v36, %v463_v31 }
 0x19c   :  { %1196 = vmatmul.msk.f32.gmra.mxu1 %vm565_vm10, %v547_v3 }
 0x1a1   :  { %v390_v60 = vpop.permute.xlu1 %389  ;;  %v315_v17 = vpop.permute.xlu0 %314 }
 0x1a2   :  { %v516_v23 = vsel %vm505_vm8, %v500_v34, %v315_v17 }
 0x1a3   :  { %v532_v39 = vsel %vm521_vm7, %v516_v23, %v390_v60 }
 0x1a4   :  { %v548_v40 = vsel %vm537_vm9, %v532_v39, %v465_v62 }
 0x1a5   :  { %1197 = vmatmul.msk.f32.gmra.mxu1 %vm565_vm10, %v548_v40 }
 0x1b0   :  { %v631_v41 = vpop.f32.mrf.mxu1 }
 0x1b1   :  { %v632_v22 = vadd.f32 %v1241_v24, %v631_v41 }
 0x1b3   :  { %v674_v63 = vmax.f32 %v632_v22, 0.0 }
 0x1b9   :  { %v634_v58 = vpop.f32.mrf.mxu1 }
 0x1ba   :  { %v635_v19 = vadd.f32 %v1241_v24, %v634_v58 }
 0x1bc   :  { %v675_v57 = vmax.f32 %v635_v19, 0.0 }
 0x1c2   :  { %v637_v7 = vpop.f32.mrf.mxu1 }
 0x1c3   :  { %v638_v52 = vadd.f32 %v1241_v24, %v637_v7 }
 0x1c5   :  { %v676_v10 = vmax.f32 %v638_v52, 0.0  ;;  %v850_v52 = vld [vmem:[#allocation2 + $0x68] sm:$0xff] }
 0x1d0   :  { %v640_v43 = vpop.f32.mrf.mxu1 }
 0x1d1   :  { %v641_v14 = vadd.f32 %v1241_v24, %v640_v43 }
 0x1d3   :  { %v677_v20 = vmax.f32 %v641_v14, 0.0  ;;  %v852_v14 = vld [vmem:[#allocation2 + $0x78] sm:$0xff] }
 0x1d8   :  { %v643_v44 = vpop.f32.mrf.mxu1 }
 0x1d9   :  { %v644_v56 = vadd.f32 %v1241_v24, %v643_v44 }
 0x1db   :  { %v678_v18 = vmax.f32 %v644_v56, 0.0  ;;  %v854_v56 = vld [vmem:[#allocation2 + $0x88] sm:$0xff] }
 0x1e9   :  { %v646_v45 = vpop.f32.mrf.mxu1 }
 0x1ea   :  { %v647_v13 = vadd.f32 %v1241_v24, %v646_v45 }
 0x1ec   :  { %v679_v15 = vmax.f32 %v647_v13, 0.0  ;;  %v856_v13 = vld [vmem:[#allocation2 + $0x98] sm:$0xff] }
 0x1f2   :  { %v649_v21 = vpop.f32.mrf.mxu1 }
 0x1f3   :  { %v650_v48 = vadd.f32 %v1241_v24, %v649_v21 }
 0x1f5   :  { %v680_v1 = vmax.f32 %v650_v48, 0.0  ;;  %v858_v48 = vld [vmem:[#allocation2 + $0xa8] sm:$0xff] }
 0x1f6   :  { %879 = vmatpush.msrb.mxu3 %v858_v48 }
 0x201   :  { %v661_v51 = vpop.f32.mrf.mxu2 }
 0x202   :  { %v662_v37 = vadd.f32 %v1241_v24, %v661_v51 }
 0x204   :  { %v684_v6 = vmax.f32 %v662_v37, 0.0 }
 0x208   :  { %v652_v32 = vpop.f32.mrf.mxu1 }
 0x209   :  { %v664_v46 = vpop.f32.mrf.mxu2  ;;  %v653_v11 = vadd.f32 %v1241_v24, %v652_v32 }
 0x20a   :  { %v665_v59 = vadd.f32 %v1241_v24, %v664_v46 }
 0x20b   :  { %v681_v25 = vmax.f32 %v653_v11, 0.0 }
 0x20c   :  { %v685_v35 = vmax.f32 %v665_v59, 0.0 }
 0x211   :  { %v667_v47 = vpop.f32.mrf.mxu2 }
 0x212   :  { %v668_v27 = vadd.f32 %v1241_v24, %v667_v47 }
 0x214   :  { %v686_v55 = vmax.f32 %v668_v27, 0.0 }
 0x219   :  { %v655_v4 = vpop.f32.mrf.mxu1  ;;  %v670_v53 = vpop.f32.mrf.mxu2 }
 0x21a   :  { %v671_v49 = vadd.f32 %v1241_v24, %v670_v53  ;;  %v656_v9 = vadd.f32 %v1241_v24, %v655_v4 }
 0x21c   :  { %v687_v61 = vmax.f32 %v671_v49, 0.0  ;;  %v682_v5 = vmax.f32 %v656_v9, 0.0 }
 0x21e   :  { %1202 = vmatpush.msk.msrb.mxu2 %vm414_vm4, %v687_v61 }
 0x220   :  { %714 = vmatpush.msrb.mxu2 %v686_v55 }
 0x222   :  { %v658_v2 = vpop.f32.mrf.mxu1  ;;  %715 = vmatpush.msrb.mxu2 %v685_v35 }
 0x223   :  { %v659_v8 = vadd.f32 %v1241_v24, %v658_v2 }
 0x224   :  { %716 = vmatpush.msrb.mxu2 %v684_v6 }
 0x225   :  { %v683_v12 = vmax.f32 %v659_v8, 0.0 }
 0x227   :  { %717 = vmatpush.msrb.mxu2 %v683_v12 }
 0x229   :  { %718 = vmatpush.msrb.mxu2 %v682_v5  ;;  %v857_v5 = vld [vmem:[#allocation2 + $0xa0] sm:$0xff] }
 0x22a   :  { %880 = vmatpush.msrb.mxu3 %v857_v5 }
 0x22b   :  { %719 = vmatpush.msrb.mxu2 %v681_v25  ;;  %v855_v25 = vld [vmem:[#allocation2 + $0x90] sm:$0xff] }
 0x22c   :  { %881 = vmatpush.msrb.mxu3 %v856_v13 }
 0x22d   :  { %720 = vmatpush.msrb.mxu2 %v680_v1  ;;  %v853_v1 = vld [vmem:[#allocation2 + $0x80] sm:$0xff] }
 0x22e   :  { %882 = vmatpush.msrb.mxu3 %v855_v25 }
 0x22f   :  { %721 = vmatpush.msrb.mxu2 %v679_v15  ;;  %v851_v15 = vld [vmem:[#allocation2 + $0x70] sm:$0xff] }
 0x230   :  { %883 = vmatpush.msrb.mxu3 %v854_v56 }
 0x231   :  { %722 = vmatpush.msrb.mxu2 %v678_v18  ;;  %v849_v18 = vld [vmem:[#allocation2 + $0x60] sm:$0xff] }
 0x232   :  { %884 = vmatpush.msrb.mxu3 %v853_v1 }
 0x233   :  { %723 = vmatpush.msrb.mxu2 %v677_v20 }
 0x234   :  { %885 = vmatpush.msrb.mxu3 %v852_v14 }
 0x235   :  { %724 = vmatpush.msrb.mxu2 %v676_v10 }
 0x236   :  { %886 = vmatpush.msrb.mxu3 %v851_v15 }
 0x237   :  { %725 = vmatpush.msrb.mxu2 %v675_v57 }
 0x238   :  { %887 = vmatpush.msrb.mxu3 %v850_v52 }
 0x239   :  { %726 = vmatpush.msrb.mxu2 %v674_v63 }
 0x23a   :  { %888 = vmatpush.msrb.mxu3 %v849_v18 }
 0x23b   :  { %727 = vmatpush.msrb.mxu2 %v673_v28 }
 0x23c   :  { %1203 = vmatmul.msk.f32.vlgmr.msrb.gmra.mxu2 %vm693_vm11, %v688_v29 }
 0x244   :  { %1204 = vmatmul.msk.f32.gmra.mxu2 %vm693_vm11, %v689_v42 }
 0x24c   :  { %1205 = vmatmul.msk.f32.gmra.mxu2 %vm693_vm11, %v690_v26 }
 0x254   :  { %1206 = vmatmul.msk.f32.gmra.mxu2 %vm693_vm11, %v691_v50 }
 0x25c   :  { %1207 = vmatmul.msk.f32.gmra.mxu2 %vm693_vm11, %v692_v38 }
 0x2bf   :  { %v1787_v30 = vpop.f32.mrf.mxu2 }
 0x2c0   :  { %v791_v0 = vrot.slane %v1787_v30, 3  ;;  %v770_v33 = vrot.slane %v1787_v30, 2  ;;  %v749_v34 = vrot.slane %v1787_v30, 1  ;;  %v812_v58 = vrot.slane %v1787_v30, 4 }
 0x2c7   :  { %v1789_v31 = vpop.f32.mrf.mxu2 }
 0x2c8   :  { %v792_v36 = vrot.slane %v1789_v31, 3  ;;  %v771_v3 = vrot.slane %v1789_v31, 2  ;;  %v750_v60 = vrot.slane %v1789_v31, 1  ;;  %v813_v40 = vrot.slane %v1789_v31, 4 }
 0x2ca   :  { %v793_v17 = vsel %vm339_vm2, %v791_v0, %v792_v36  ;;  %v772_v23 = vsel %vm264_vm5, %v770_v33, %v771_v3  ;;  %v751_v62 = vsel %vm189_vm3, %v749_v34, %v750_v60  ;;  %v814_v44 = vsel %vm414_vm4, %v812_v58, %v813_v40 }
 0x2cb   :  { %800 = vrot.lane.b32.xlu2 %v793_v17, %s1301_s0  ;;  %779 = vrot.lane.b32.xlu1 %v772_v23, %s1304_s18 }
 0x2cc   :  { %758 = vrot.lane.b32.xlu0 %v751_v62, %s1302_s17 }
 0x2cf   :  { %v1803_v39 = vpop.f32.mrf.mxu2 }
 0x2d0   :  { %v773_v16 = vrot.slane %v1803_v39, 2  ;;  %v752_v41 = vrot.slane %v1803_v39, 1  ;;  %v815_v45 = vrot.slane %v1803_v39, 4  ;;  %v794_v21 = vrot.slane %v1803_v39, 3 }
 0x2d2   :  { %v774_v7 = vsel %vm264_vm5, %v771_v3, %v773_v16  ;;  %v753_v43 = vsel %vm189_vm3, %v750_v60, %v752_v41  ;;  %v816_v32 = vsel %vm414_vm4, %v813_v40, %v815_v45  ;;  %v795_v24 = vsel %vm339_vm2, %v792_v36, %v794_v21 }
 0x2d3   :  { %781 = vrot.lane.b32.xlu2 %v774_v7, %s1304_s18  ;;  %760 = vrot.lane.b32.xlu1 %v753_v43, %s1302_s17 }
 0x2d4   :  { %821 = vrot.lane.b32.xlu0 %v814_v44, %s1303_s1 }
 0x2d7   :  { %v1816_v51 = vpop.f32.mrf.mxu2 }
 0x2d8   :  { %v754_v46 = vrot.slane %v1816_v51, 1  ;;  %v796_v4 = vrot.slane %v1816_v51, 3  ;;  %v817_v53 = vrot.slane %v1816_v51, 4  ;;  %v775_v27 = vrot.slane %v1816_v51, 2 }
 0x2da   :  { %v755_v47 = vsel %vm189_vm3, %v752_v41, %v754_v46  ;;  %v797_v49 = vsel %vm339_vm2, %v794_v21, %v796_v4  ;;  %v818_v59 = vsel %vm414_vm4, %v815_v45, %v817_v53  ;;  %v776_v37 = vsel %vm264_vm5, %v773_v16, %v775_v27  ;;  %v1242_v21 = vld [vmem:[#allocation2 + $0x180] ss:$0 sm:$0xff] }
 0x2db   :  { %823 = vrot.lane.b32.xlu1 %v816_v32, %s1303_s1  ;;  %762 = vrot.lane.b32.xlu2 %v755_v47, %s1302_s17 }
 0x2dc   :  { %802 = vrot.lane.b32.xlu0 %v795_v24, %s1301_s0 }
 0x2df   :  { %v741_v61 = vpop.f32.mrf.mxu2 }
 0x2e0   :  { %v777_v55 = vrot.slane %v741_v61, 2  ;;  %v798_v35 = vrot.slane %v741_v61, 3  ;;  %v756_v6 = vrot.slane %v741_v61, 1  ;;  %v819_v11 = vrot.slane %v741_v61, 4 }
 0x2e2   :  { %v799_v2 = vsel %vm339_vm2, %v796_v4, %v798_v35  ;;  %v778_v9 = vsel %vm264_vm5, %v775_v27, %v777_v55  ;;  %v757_v8 = vsel %vm189_vm3, %v754_v46, %v756_v6  ;;  %v820_v12 = vsel %vm414_vm4, %v817_v53, %v819_v11 }
 0x2e3   :  { %804 = vrot.lane.b32.xlu1 %v797_v49, %s1301_s0  ;;  %825 = vrot.lane.b32.xlu2 %v818_v59, %s1303_s1 }
 0x2e4   :  { %783 = vrot.lane.b32.xlu0 %v776_v37, %s1304_s18 }
 0x2eb   :  { %806 = vrot.lane.b32.xlu2 %v799_v2, %s1301_s0  ;;  %785 = vrot.lane.b32.xlu1 %v778_v9, %s1304_s18 }
 0x2ec   :  { %764 = vrot.lane.b32.xlu0 %v757_v8, %s1302_s17 }
 0x2f4   :  { %827 = vrot.lane.b32.xlu0 %v820_v12, %s1303_s1 }
 0x325   :  { %v801_v19 = vpop.permute.xlu2 %800 }
 0x32d   :  { %v782_v57 = vpop.permute.xlu2 %781 }
 0x335   :  { %v763_v38 = vpop.permute.xlu2 %762 }
 0x336   :  { %v835_v34 = vsel %vm489_vm6, %v1803_v39, %v763_v38  ;;  %v1008_v38 = vld [vmem:[#allocation2 + $0xe0] sm:$0xff] }
 0x33d   :  { %v780_v20 = vpop.permute.xlu1 %779  ;;  %v826_v23 = vpop.permute.xlu2 %825 }
 0x33e   :  { %v759_v22 = vpop.permute.xlu0 %758 }
 0x33f   :  { %v833_v10 = vsel %vm489_vm6, %v1787_v30, %v759_v22 }
 0x340   :  { %v837_v54 = vsel %vm505_vm8, %v833_v10, %v780_v20 }
 0x341   :  { %v841_v28 = vsel %vm521_vm7, %v837_v54, %v801_v19 }
 0x345   :  { %v761_v63 = vpop.permute.xlu1 %760  ;;  %v807_v7 = vpop.permute.xlu2 %806 }
 0x346   :  { %v822_v29 = vpop.permute.xlu0 %821  ;;  %v834_v26 = vsel %vm489_vm6, %v1789_v31, %v761_v63 }
 0x347   :  { %v845_v42 = vsel %vm537_vm9, %v841_v28, %v822_v29  ;;  %v838_v33 = vsel %vm505_vm8, %v834_v26, %v782_v57  ;;  %v1010_v26 = vld [vmem:[#allocation2 + $0xf0] sm:$0xff] }
 0x348   :  { %1208 = vmatmul.msk.f32.vlgmr.msrb.gmra.mxu3 %vm565_vm10, %v845_v42  ;;  %v1011_v42 = vld [vmem:[#allocation2 + $0xf8] sm:$0xff] }
 0x349   :  { %1032 = vmatpush.msra.mxu3 %v1011_v42 }
 0x34b   :  { %1033 = vmatpush.msra.mxu3 %v1010_v26  ;;  %v1125_v26 = vld [vmem:[#allocation2 + $0x160] sm:$0xff] }
 0x34d   :  { %v824_v50 = vpop.permute.xlu1 %823 }
 0x34e   :  { %v803_v0 = vpop.permute.xlu0 %802 }
 0x34f   :  { %v842_v30 = vsel %vm521_vm7, %v838_v33, %v803_v0  ;;  %v1007_v0 = vld [vmem:[#allocation2 + $0xd8] sm:$0xff]  ;;  %v1006_v33 = vld [vmem:[#allocation2 + $0xd0] sm:$0xff] }
 0x350   :  { %v846_v36 = vsel %vm537_vm9, %v842_v30, %v824_v50  ;;  %v1009_v50 = vld [vmem:[#allocation2 + $0xe8] sm:$0xff] }
 0x351   :  { %1209 = vmatmul.msk.f32.gmra.mxu3 %vm565_vm10, %v846_v36  ;;  %v1005_v30 = vld [vmem:[#allocation2 + $0xc8] sm:$0xff]  ;;  %v1004_v36 = vld [vmem:[#allocation2 + $0xc0] sm:$0xff] }
 0x352   :  { %1034 = vmatpush.msra.mxu3 %v1009_v50  ;;  %v1124_v50 = vld [vmem:[#allocation2 + $0x158] sm:$0xff] }
 0x354   :  { %1035 = vmatpush.msra.mxu3 %v1008_v38  ;;  %v1123_v38 = vld [vmem:[#allocation2 + $0x150] sm:$0xff] }
 0x355   :  { %v805_v3 = vpop.permute.xlu1 %804 }
 0x356   :  { %v784_v60 = vpop.permute.xlu0 %783  ;;  %1036 = vmatpush.msra.mxu3 %v1007_v0  ;;  %v1244_v0 = vld [vmem:[#allocation2 + $0x190] ss:$0 sm:$0xff] }
 0x357   :  { %v839_v17 = vsel %vm505_vm8, %v835_v34, %v784_v60  ;;  %v1002_v34 = vld [vmem:[#allocation2 + $0xb0] sm:$0xff] }
 0x358   :  { %v843_v31 = vsel %vm521_vm7, %v839_v17, %v805_v3  ;;  %1037 = vmatpush.msra.mxu3 %v1006_v33  ;;  %v1003_v3 = vld [vmem:[#allocation2 + $0xb8] sm:$0xff] }
 0x359   :  { %v847_v62 = vsel %vm537_vm9, %v843_v31, %v826_v23 }
 0x35a   :  { %1210 = vmatmul.msk.f32.gmra.mxu3 %vm565_vm10, %v847_v62 }
 0x35b   :  { %1038 = vmatpush.msra.mxu3 %v1005_v30 }
 0x35d   :  { %v786_v16 = vpop.permute.xlu1 %785  ;;  %1039 = vmatpush.msra.mxu3 %v1004_v36 }
 0x35e   :  { %v765_v40 = vpop.permute.xlu0 %764 }
 0x35f   :  { %v836_v41 = vsel %vm489_vm6, %v1816_v51, %v765_v40  ;;  %1040 = vmatpush.msra.mxu3 %v1003_v3  ;;  %v1245_v3 = vld [vmem:[#allocation2 + $0x198] ss:$0 sm:$0xff] }
 0x360   :  { %v840_v58 = vsel %vm505_vm8, %v836_v41, %v786_v16 }
 0x361   :  { %v844_v39 = vsel %vm521_vm7, %v840_v58, %v807_v7  ;;  %1041 = vmatpush.msra.mxu3 %v1002_v34 }
 0x366   :  { %v828_v43 = vpop.permute.xlu0 %827 }
 0x367   :  { %v848_v44 = vsel %vm537_vm9, %v844_v39, %v828_v43 }
 0x368   :  { %1211 = vmatmul.msk.f32.gmra.mxu3 %vm565_vm10, %v848_v44 }
 0x3cb   :  { %v890_v45 = vpop.f32.mrf.mxu3 }
 0x3cc   :  { %v891_v46 = vadd.f32 %v1242_v21, %v890_v45 }
 0x3ce   :  { %v1867_v32 = vmax.f32 %v891_v46, 0.0 }
 0x3d0   :  { %v929_v51 = vrot.slane %v1867_v32, 2  ;;  %v910_v53 = vrot.slane %v1867_v32, 1  ;;  %v948_v59 = vrot.slane %v1867_v32, 3  ;;  %v967_v11 = vrot.slane %v1867_v32, 4 }
 0x3d4   :  { %v893_v47 = vpop.f32.mrf.mxu3 }
 0x3d5   :  { %v894_v24 = vadd.f32 %v1242_v21, %v893_v47 }
 0x3d7   :  { %v1869_v4 = vmax.f32 %v894_v24, 0.0 }
 0x3d9   :  { %v930_v27 = vrot.slane %v1869_v4, 2  ;;  %v911_v49 = vrot.slane %v1869_v4, 1  ;;  %v949_v61 = vrot.slane %v1869_v4, 3  ;;  %v968_v9 = vrot.slane %v1869_v4, 4 }
 0x3db   :  { %v931_v37 = vsel %vm264_vm5, %v929_v51, %v930_v27  ;;  %v912_v55 = vsel %vm189_vm3, %v910_v53, %v911_v49  ;;  %v950_v35 = vsel %vm339_vm2, %v948_v59, %v949_v61  ;;  %v969_v5 = vsel %vm414_vm4, %v967_v11, %v968_v9 }
 0x3dc   :  { %936 = vrot.lane.b32.xlu2 %v931_v37, %s1304_s18  ;;  %917 = vrot.lane.b32.xlu1 %v912_v55, %s1302_s17 }
 0x3dd   :  { %955 = vrot.lane.b32.xlu0 %v950_v35, %s1301_s0  ;;  %v896_v6 = vpop.f32.mrf.mxu3 }
 0x3de   :  { %v897_v2 = vadd.f32 %v1242_v21, %v896_v6 }
 0x3e0   :  { %v1884_v8 = vmax.f32 %v897_v2, 0.0 }
 0x3e2   :  { %v913_v12 = vrot.slane %v1884_v8, 1  ;;  %v932_v48 = vrot.slane %v1884_v8, 2  ;;  %v951_v56 = vrot.slane %v1884_v8, 3  ;;  %v970_v1 = vrot.slane %v1884_v8, 4 }
 0x3e4   :  { %974 = vrot.lane.b32.xlu1 %v969_v5, %s1303_s1  ;;  %v914_v13 = vsel %vm189_vm3, %v911_v49, %v913_v12  ;;  %v933_v25 = vsel %vm264_vm5, %v930_v27, %v932_v48  ;;  %v952_v15 = vsel %vm339_vm2, %v949_v61, %v951_v56  ;;  %v971_v18 = vsel %vm414_vm4, %v968_v9, %v970_v1 }
 0x3e5   :  { %919 = vrot.lane.b32.xlu2 %v914_v13, %s1302_s17  ;;  %938 = vrot.lane.b32.xlu0 %v933_v25, %s1304_s18 }
 0x3eb   :  { %v899_v14 = vpop.f32.mrf.mxu3 }
 0x3ec   :  { %v900_v52 = vadd.f32 %v1242_v21, %v899_v14  ;;  %957 = vrot.lane.b32.xlu1 %v952_v15, %s1301_s0 }
 0x3ed   :  { %976 = vrot.lane.b32.xlu2 %v971_v18, %s1303_s1 }
 0x3ee   :  { %v1901_v19 = vmax.f32 %v900_v52, 0.0 }
 0x3f0   :  { %v915_v20 = vrot.slane %v1901_v19, 1  ;;  %v934_v22 = vrot.slane %v1901_v19, 2  ;;  %v953_v10 = vrot.slane %v1901_v19, 3  ;;  %v972_v28 = vrot.slane %v1901_v19, 4 }
 0x3f2   :  { %v916_v54 = vsel %vm189_vm3, %v913_v12, %v915_v20  ;;  %v935_v57 = vsel %vm264_vm5, %v932_v48, %v934_v22  ;;  %v954_v63 = vsel %vm339_vm2, %v951_v56, %v953_v10  ;;  %v973_v29 = vsel %vm414_vm4, %v970_v1, %v972_v28  ;;  %v1243_v48 = vld [vmem:[#allocation2 + $0x188] ss:$0 sm:$0xff] }
 0x3f3   :  { %921 = vrot.lane.b32.xlu0 %v916_v54, %s1302_s17 }
 0x3f4   :  { %940 = vrot.lane.b32.xlu1 %v935_v57, %s1304_s18 }
 0x3f5   :  { %959 = vrot.lane.b32.xlu2 %v954_v63, %s1301_s0  ;;  %v1093_v63 = vld [vmem:[#allocation2 + $0x130] sm:$0xff] }
 0x3fb   :  { %978 = vrot.lane.b32.xlu0 %v973_v29, %s1303_s1 }
 0x3fc   :  { %923 = vrot.lane.b32.xlu1 %v915_v20, %s1302_s17  ;;  %v1096_v20 = vld [vmem:[#allocation2 + $0x148] sm:$0xff] }
 0x3fd   :  { %942 = vrot.lane.b32.xlu2 %v934_v22, %s1304_s18  ;;  %v1095_v22 = vld [vmem:[#allocation2 + $0x140] sm:$0xff] }
 0x403   :  { %961 = vrot.lane.b32.xlu0 %v953_v10, %s1301_s0  ;;  %v1094_v10 = vld [vmem:[#allocation2 + $0x138] sm:$0xff] }
 0x404   :  { %980 = vrot.lane.b32.xlu1 %v972_v28, %s1303_s1  ;;  %v1126_v28 = vld [vmem:[#allocation2 + $0x168] sm:$0xff] }
 0x405   :  { %1144 = vmatpush.msrb.mxu3 %v1126_v28 }
 0x407   :  { %1145 = vmatpush.msrb.mxu3 %v1125_v26 }
 0x409   :  { %1146 = vmatpush.msrb.mxu3 %v1124_v50 }
 0x40b   :  { %1147 = vmatpush.msrb.mxu3 %v1123_v38 }
 0x436   :  { %v937_v60 = vpop.permute.xlu2 %936 }
 0x43f   :  { %v920_v40 = vpop.permute.xlu2 %919 }
 0x440   :  { %v987_v43 = vsel %vm489_vm6, %v1869_v4, %v920_v40 }
 0x447   :  { %v977_v45 = vpop.permute.xlu2 %976 }
 0x44e   :  { %v918_v17 = vpop.permute.xlu1 %917 }
 0x44f   :  { %v986_v23 = vsel %vm489_vm6, %v1867_v32, %v918_v17  ;;  %v956_v31 = vpop.permute.xlu0 %955  ;;  %v960_v51 = vpop.permute.xlu2 %959 }
 0x450   :  { %v990_v62 = vsel %vm505_vm8, %v986_v23, %v937_v60 }
 0x451   :  { %v994_v16 = vsel %vm521_vm7, %v990_v62, %v956_v31 }
 0x456   :  { %v975_v41 = vpop.permute.xlu1 %974 }
 0x457   :  { %v998_v58 = vsel %vm537_vm9, %v994_v16, %v975_v41  ;;  %v939_v7 = vpop.permute.xlu0 %938  ;;  %v943_v37 = vpop.permute.xlu2 %942 }
 0x458   :  { %1212 = vmatmul.msk.f32.vlgmr.msra.gmra.mxu3 %vm565_vm10, %v998_v58  ;;  %v991_v39 = vsel %vm505_vm8, %v987_v43, %v939_v7 }
 0x45e   :  { %v958_v44 = vpop.permute.xlu1 %957 }
 0x45f   :  { %v995_v21 = vsel %vm521_vm7, %v991_v39, %v958_v44 }
 0x460   :  { %v999_v46 = vsel %vm537_vm9, %v995_v21, %v977_v45 }
 0x461   :  { %1213 = vmatmul.msk.f32.gmra.mxu3 %vm565_vm10, %v999_v46 }
 0x465   :  { %v922_v32 = vpop.permute.xlu0 %921 }
 0x466   :  { %v941_v47 = vpop.permute.xlu1 %940  ;;  %v988_v24 = vsel %vm489_vm6, %v1884_v8, %v922_v32 }
 0x467   :  { %v992_v53 = vsel %vm505_vm8, %v988_v24, %v941_v47 }
 0x468   :  { %v996_v4 = vsel %vm521_vm7, %v992_v53, %v960_v51 }
 0x46d   :  { %v979_v27 = vpop.permute.xlu0 %978 }
 0x46e   :  { %v924_v49 = vpop.permute.xlu1 %923  ;;  %v1000_v59 = vsel %vm537_vm9, %v996_v4, %v979_v27 }
 0x46f   :  { %1214 = vmatmul.msk.f32.gmra.mxu3 %vm565_vm10, %v1000_v59  ;;  %v989_v61 = vsel %vm489_vm6, %v1901_v19, %v924_v49  ;;  %v1059_v19 = vld [vmem:[#allocation2 + $0x128] sm:$0xf] }
 0x470   :  { %v993_v55 = vsel %vm505_vm8, %v989_v61, %v943_v37 }
 0x475   :  { %v962_v35 = vpop.permute.xlu0 %961 }
 0x476   :  { %v997_v6 = vsel %vm521_vm7, %v993_v55, %v962_v35  ;;  %v981_v2 = vpop.permute.xlu1 %980 }
 0x477   :  { %v1001_v9 = vsel %vm537_vm9, %v997_v6, %v981_v2 }
 0x478   :  { %1215 = vmatmul.msk.f32.gmra.mxu3 %vm565_vm10, %v1001_v9 }
 0x4db   :  { %v1043_v8 = vpop.f32.mrf.mxu3 }
 0x4dc   :  { %v1044_v14 = vadd.f32 %v1243_v48, %v1043_v8 }
 0x4de   :  { %v1055_v18 = vmax.f32 %v1044_v14, 0.0 }
 0x4e4   :  { %v1046_v11 = vpop.f32.mrf.mxu3 }
 0x4e5   :  { %v1047_v56 = vadd.f32 %v1243_v48, %v1046_v11 }
 0x4e7   :  { %v1056_v52 = vmax.f32 %v1047_v56, 0.0 }
 0x4f2   :  { %v1049_v12 = vpop.f32.mrf.mxu3 }
 0x4f3   :  { %v1050_v13 = vadd.f32 %v1243_v48, %v1049_v12 }
 0x4f5   :  { %v1057_v15 = vmax.f32 %v1050_v13, 0.0 }
 0x4fb   :  { %v1052_v5 = vpop.f32.mrf.mxu3 }
 0x4fc   :  { %v1053_v25 = vadd.f32 %v1243_v48, %v1052_v5 }
 0x4fe   :  { %v1058_v1 = vmax.f32 %v1053_v25, 0.0 }
 0x500   :  { %1216 = vmatpush.msk.msra.mxu2 %vm414_vm4, %v1058_v1 }
 0x502   :  { %1080 = vmatpush.msra.mxu2 %v1057_v15 }
 0x504   :  { %1081 = vmatpush.msra.mxu2 %v1056_v52 }
 0x506   :  { %1082 = vmatpush.msra.mxu2 %v1055_v18 }
 0x507   :  { %1217 = vmatmul.msk.f32.vlgmr.msra.gmra.mxu2 %vm1060_vm12, %v1059_v19 }
 0x508   :  { %1114 = vmatpush.msrb.mxu2 %v1096_v20 }
 0x50a   :  { %1115 = vmatpush.msrb.mxu2 %v1095_v22 }
 0x50c   :  { %1116 = vmatpush.msrb.mxu2 %v1094_v10 }
 0x50e   :  { %1117 = vmatpush.msrb.mxu2 %v1093_v63 }
 0x58a   :  { %v1084_v54 = vpop.f32.mrf.mxu2 }
 0x58b   :  { %v1088_v57 = vrot.slane %v1084_v54, 2 }
 0x58d   :  { %1089 = vrot.lane.b32.xlu2 %v1088_v57, %s1302_s17 }
 0x5e7   :  { %v1090_v29 = vpop.permute.xlu2 %1089 }
 0x5e8   :  { %v1092_v42 = vsel %vm489_vm6, %v1084_v54, %v1090_v29 }
 0x5e9   :  { %1218 = vmatmul.msk.f32.vlgmr.msrb.gmra.mxu2 %vm505_vm8, %v1092_v42 }
 0x66c   :  { %v1119_v33 = vpop.f32.mrf.mxu2 }
 0x66d   :  { %v1120_v30 = vadd.f32 %v1244_v0, %v1119_v33 }
 0x66f   :  { %v1122_v36 = vmax.f32 %v1120_v30, 0.0 }
 0x671   :  { %1219 = vmatmul.msk.f32.vlgmr.msrb.gmra.mxu3 %vm505_vm8, %v1122_v36 }
 0x6f4   :  { %v1149_v34 = vpop.f32.mrf.mxu3 }
 0x6f5   :  { %v1150_v60 = vadd.f32 %v1245_v3, %v1149_v34 }
 0x6f7   :  { %1153 = vst.msk [vmem:[#allocation5] sm:$0x3] %vm1152_vm13, %v1150_v60 }
 0x6f8   :  { %1164 = dma.vmem_to_hbm [thread:$0]  %s1160_s20, 32, %s1162_s23, [#allocation4]  }
 0x6f9   :  { %1296 = dma.done.wait [#allocation4], 32  }
 0x6fa   :  { %1297 = vsyncadd [#allocation4], 4294967264 }
 0x6fb   :  { %1169 = vsyncpa [#allocation3], 1 }
 0x6fc   :  { %1170 = vsyncpa [#allocation4], 1 }

</bundles_post_ra>
